<compile_context>
chip_gen: v7x
topology: tpu7x:2x2x1
jax: 0.10.0
libtpu: 0.0.40
codegen_flags: <defaults>
</compile_context>

<pallas_src>
import functools

import jax
import jax.numpy as jnp
from jax.experimental import pallas as pl
from jax.experimental.pallas import tpu as pltpu


# Conservative budget for the double-buffered pipelined blocks; safe against the
# default scoped VMEM on all of v5e (16 MiB) / v6e (32 MiB) / v7x (32 MiB).
_VMEM_BLOCK_BUDGET_BYTES = 12 << 20


def _round_up(v, m):
    return -(-v // m) * m


def _tensorcores_per_chip():
    """Best-effort detection of megacore chips (2 TensorCores per device)."""
    try:
        kind = jax.devices()[0].device_kind.lower()
    except Exception:
        return 1
    # v4- and v7-class chips expose two TensorCores per device.
    if "v7" in kind or "v4" in kind:
        return 2
    return 1


def _categorical_head_kernel(xt_ref, w_ref, b_ref, logits_ref, probs_ref):
    # z^T = W @ x^T on the MXU (f32 accumulate): [A, D] @ [D, TB] -> [A, TB].
    z = jnp.dot(w_ref[...], xt_ref[...], preferred_element_type=jnp.float32)
    z = z + b_ref[...]                        # bias [A, 1] broadcast over lanes

    # Numerically-stable log-softmax over the action axis (sublane axis; with
    # A=16 this is a cheap 2-vreg sublane reduce, not a 128-lane XLU tree).
    m = jnp.max(z, axis=0, keepdims=True)     # [1, TB]
    zc = z - m
    e = jnp.exp(zc)                           # the only full-tile exp (EUP)
    s = jnp.sum(e, axis=0, keepdims=True)     # [1, TB]
    logits_n = zc - jnp.log(s)                # normalized logits (Categorical storage)

    logits_ref[...] = logits_n.astype(logits_ref.dtype)
    # probs = softmax: reuse e with one per-row reciprocal + a VALU multiply
    # instead of a second full-tile exp on the single EUP slot.
    probs_ref[...] = (e * pl.reciprocal(s, approx=False)).astype(probs_ref.dtype)


def _auto_batch_tile(B, D, A):
    """Largest multiple-of-128 batch (lane) tile whose double-buffered,
    (8,128)-padded f32 blocks fit the VMEM budget."""
    dp = _round_up(D, 8)
    ap = _round_up(A, 8)
    padded_b = _round_up(B, 128)
    # Resident (non-batch-tiled) blocks, double-buffered and lane-padded: W, bias.
    resident = 2 * (ap * _round_up(D, 128) + ap * 128) * 4
    budget = max(_VMEM_BLOCK_BUDGET_BYTES - resident, 1 << 20)
    # Batch-tiled blocks per lane (batch column): x^T tile (dp sublanes) plus
    # logits^T and probs^T tiles (ap sublanes each), f32, double-buffered.
    per_col = 2 * (dp + 2 * ap) * 4
    tb = max(128, (budget // per_col) // 128 * 128)
    # Megacore (2 TensorCores): keep >=2 grid tiles when the batch is big enough
    # so dimension_semantics=("parallel",) can shard them across both cores.
    if _tensorcores_per_chip() >= 2 and padded_b >= 256:
        tb = min(tb, _round_up(-(-padded_b // 2), 128))
    return min(tb, padded_b)


@functools.partial(jax.jit, static_argnames=("batch_tile", "probs_dtype"))
def categorical_head(x, w_t, b, *, batch_tile=None, probs_dtype=jnp.float32):
    """x: [B, num_inputs], w_t: [num_inputs, num_outputs], b: [num_outputs].

    Returns (normalized_logits, probs), both [B, num_outputs]; logits are f32,
    probs in `probs_dtype` (f32 default, bf16 halves writeback traffic).
    """
    B, D = x.shape
    A = w_t.shape[1]

    # Transposed, lane-dense layout: batch lives on the 128-lane axis everywhere.
    xt = jnp.transpose(x)                         # [D, B]
    w = jnp.transpose(w_t)                        # [A, D]  (PyTorch weight layout)
    b2 = b.reshape(A, 1).astype(jnp.float32)      # [A, 1]

    out_shapes = (
        jax.ShapeDtypeStruct((A, B), jnp.float32),   # normalized logits^T
        jax.ShapeDtypeStruct((A, B), probs_dtype),   # probs^T
    )

    padded_b = _round_up(B, 128)
    if batch_tile is None:
        tb = _auto_batch_tile(B, D, A)
    else:
        tb = min(max(_round_up(int(batch_tile), 128), 128), padded_b)
    num_tiles = pl.cdiv(B, tb)

    if num_tiles <= 1:
        # Single tile: skip the pipeline entirely (no grid, no double-buffer).
        vmem = pl.BlockSpec(memory_space=pltpu.MemorySpace.VMEM)
        logits_t, probs_t = pl.pallas_call(
            _categorical_head_kernel,
            out_shape=out_shapes,
            in_specs=[vmem, vmem, vmem],
            out_specs=(vmem, vmem),
        )(xt, w, b2)
    else:
        # Batch-tiled path: x^T / outputs tiled over the lane (batch) axis,
        # weights and bias resident across the grid.
        logits_t, probs_t = pl.pallas_call(
            _categorical_head_kernel,
            out_shape=out_shapes,
            grid_spec=pltpu.PrefetchScalarGridSpec(
                num_scalar_prefetch=0,
                grid=(num_tiles,),
                in_specs=[
                    pl.BlockSpec((D, tb), lambda i: (0, i)),   # x^T batch tile
                    pl.BlockSpec((A, D), lambda i: (0, 0)),    # resident weights
                    pl.BlockSpec((A, 1), lambda i: (0, 0)),    # resident bias
                ],
                out_specs=[
                    pl.BlockSpec((A, tb), lambda i: (0, i)),
                    pl.BlockSpec((A, tb), lambda i: (0, i)),
                ],
            ),
            compiler_params=pltpu.CompilerParams(
                # Batch tiles are independent -> megacore-parallel on 2-TC chips.
                dimension_semantics=("parallel",),
            ),
        )(xt, w, b2)
        # NOTE: when B % tb != 0 the final tile computes on padded (undefined)
        # lanes; any inf/NaN there stays confined to those columns and Pallas
        # discards the out-of-bounds output lanes, so the results are exact.

    # Back to the module's [B, A] layout (wrapper-side layout plumbing).
    return jnp.transpose(logits_t), jnp.transpose(probs_t)


def make_params(key, num_inputs, num_outputs, gain=0.01):
    """Mirror init_(nn.Linear): orthogonal_(weight, gain=0.01), bias = 0."""
    # PyTorch Linear weight shape is (num_outputs, num_inputs); orthogonal init
    # on that shape, then transpose so the head computes x @ W^T.
    w_pt = jax.nn.initializers.orthogonal(scale=gain)(
        key, (num_outputs, num_inputs), jnp.float32
    )
    w_t = jnp.transpose(w_pt)                      # [num_inputs, num_outputs]
    b = jnp.zeros((num_outputs,), jnp.float32)
    return w_t, b


if __name__ == "__main__":
    key = jax.random.PRNGKey(0)
    k_w, k_x1, k_x2 = jax.random.split(key, 3)

    num_inputs = 32
    num_outputs = 16
    w_t, b = make_params(k_w, num_inputs, num_outputs, gain=0.01)

    def reference(xv):
        z = xv @ w_t + b
        logits_r = z - jax.scipy.special.logsumexp(z, axis=-1, keepdims=True)
        probs_r = jax.nn.softmax(z, axis=-1)
        return logits_r, probs_r

    # --- small batch: exercises the pipeline-free (no-grid) path ---
    x_small = jax.random.normal(k_x1, (8, num_inputs), dtype=jnp.float32)
    logits, probs = categorical_head(x_small, w_t, b)
    jax.block_until_ready((logits, probs))
    l_ref, p_ref = reference(x_small)
    assert logits.shape == (8, num_outputs) and probs.shape == (8, num_outputs)
    assert jnp.allclose(logits, l_ref, atol=1e-5, rtol=1e-5)
    assert jnp.allclose(probs, p_ref, atol=1e-5, rtol=1e-5)

    # --- larger, non-multiple-of-128 batch: lane-dense batch-tiled path with a
    #     partial final tile ---
    x_big = jax.random.normal(k_x2, (300, num_inputs), dtype=jnp.float32)
    logits2, probs2 = categorical_head(x_big, w_t, b, batch_tile=128)
    jax.block_until_ready((logits2, probs2))
    l_ref2, p_ref2 = reference(x_big)
    assert jnp.allclose(logits2, l_ref2, atol=1e-5, rtol=1e-5)
    assert jnp.allclose(probs2, p_ref2, atol=1e-5, rtol=1e-5)

    # --- optional reduced-writeback probs (bf16) ---
    _, probs_bf16 = categorical_head(
        x_big, w_t, b, batch_tile=128, probs_dtype=jnp.bfloat16
    )
    jax.block_until_ready(probs_bf16)
    assert jnp.allclose(probs_bf16.astype(jnp.float32), p_ref2, atol=1e-2, rtol=1e-2)

    # FixedCategorical consumers are trivial reductions over the outputs,
    # e.g. mode = probs.argmax(-1, keepdims=True).
    _ = jnp.argmax(probs, axis=-1, keepdims=True)

    print("KERNEL_OK")
</pallas_src>

<mosaic_0001>
module attributes {stable_mosaic.version = 11 : i64} {
  func.func @_categorical_head_kernel(%arg0: memref<32x8xf32, #tpu.memory_space<vmem>>, %arg1: memref<16x32xf32, #tpu.memory_space<vmem>>, %arg2: memref<16x1xf32, #tpu.memory_space<vmem>>, %arg3: memref<16x8xf32, #tpu.memory_space<vmem>>, %arg4: memref<16x8xf32, #tpu.memory_space<vmem>>) attributes {dimension_semantics = [], scalar_prefetch = 0 : i64, scratch_operands = 0 : i64, tpu.core_type = #tpu.core_type<tc>} {
    %c0 = arith.constant 0 : index
    %c0_0 = arith.constant 0 : index
    %0 = vector.load %arg1[%c0, %c0_0] : memref<16x32xf32, #tpu.memory_space<vmem>>, vector<16x32xf32>
    %c0_1 = arith.constant 0 : index
    %c0_2 = arith.constant 0 : index
    %1 = vector.load %arg0[%c0_1, %c0_2] : memref<32x8xf32, #tpu.memory_space<vmem>>, vector<32x8xf32>
    %cst = arith.constant dense<0.000000e+00> : vector<16x8xf32>
    %2 = tpu.matmul %0, %1, %cst {dimension_numbers = #tpu.dot_dimension_numbers<[1], [0], [0], [1], [0, 0, 1, 1], [], []>} : vector<16x32xf32>, vector<32x8xf32>, vector<16x8xf32> -> vector<16x8xf32>
    %c0_3 = arith.constant 0 : index
    %c0_4 = arith.constant 0 : index
    %3 = vector.load %arg2[%c0_3, %c0_4] : memref<16x1xf32, #tpu.memory_space<vmem>>, vector<16x1xf32>
    %4 = vector.broadcast %3 : vector<16x1xf32> to vector<16x8xf32>
    %5 = arith.addf %2, %4 : vector<16x8xf32>
    %cst_5 = arith.constant dense<0xFF800000> : vector<8xf32>
    %6 = vector.multi_reduction <maximumf>, %5, %cst_5 [0] : vector<16x8xf32> to vector<8xf32>
    %7 = vector.shape_cast %6 : vector<8xf32> to vector<1x8xf32>
    %8 = vector.broadcast %7 : vector<1x8xf32> to vector<16x8xf32>
    %9 = arith.subf %5, %8 : vector<16x8xf32>
    %10 = math.exp %9 : vector<16x8xf32>
    %cst_6 = arith.constant dense<0.000000e+00> : vector<8xf32>
    %11 = vector.multi_reduction <add>, %10, %cst_6 [0] : vector<16x8xf32> to vector<8xf32>
    %12 = vector.shape_cast %11 : vector<8xf32> to vector<1x8xf32>
    %13 = math.log %12 : vector<1x8xf32>
    %14 = vector.broadcast %13 : vector<1x8xf32> to vector<16x8xf32>
    %15 = arith.subf %9, %14 : vector<16x8xf32>
    %c0_7 = arith.constant 0 : index
    %c0_8 = arith.constant 0 : index
    %16 = vector.load %arg3[%c0_7, %c0_8] : memref<16x8xf32, #tpu.memory_space<vmem>>, vector<16x8xf32>
    tpu.vector_store %arg3[%c0_7, %c0_8], %15 {strides = array<i32>} : memref<16x8xf32, #tpu.memory_space<vmem>>, vector<16x8xf32>,
    %17 = tpu.reciprocal %12 : vector<1x8xf32> -> vector<1x8xf32>
    %18 = vector.broadcast %17 : vector<1x8xf32> to vector<16x8xf32>
    %19 = arith.mulf %10, %18 : vector<16x8xf32>
    %c0_9 = arith.constant 0 : index
    %c0_10 = arith.constant 0 : index
    %20 = vector.load %arg4[%c0_9, %c0_10] : memref<16x8xf32, #tpu.memory_space<vmem>>, vector<16x8xf32>
    tpu.vector_store %arg4[%c0_9, %c0_10], %19 {strides = array<i32>} : memref<16x8xf32, #tpu.memory_space<vmem>>, vector<16x8xf32>,
    return
  }
}

</mosaic_0001>

<bundles_post_ra>
// kernel: categorical_head.1
= control target key start
LH: loop header
LB: loop body
LE: loop exit
PB: predicated region body
PF: predicated region fallthrough
CT: control target
= control target key end

     0   :  { %vm34_vm0 = vcmask 261120   ;;  %v197_v3 = vmov 0   ;;  %vm116_vm1 = vcmask 64512   ;;  %s269_s0 = inlined_call_operand.vmem [shape: f32[32,8], index: 0, kind: input, shape index: {}]   ;;  %s270_s1 = inlined_call_operand.vmem [shape: f32[16,32], index: 1, kind: input, shape index: {}]   ;;  %s271_s2 = inlined_call_operand.vmem [shape: f32[16,1], index: 2, kind: input, shape index: {}]   ;;  %s272_s4 = inlined_call_operand.vmem [shape: f32[16,8], index: 4, kind: output, shape index: {1}]   ;;  %s273_s3 = inlined_call_operand.vmem [shape: f32[16,8], index: 3, kind: output, shape index: {0}]  }
   0x1   :  { %v18_v0 = vld [vmem:[%s269_s0] sm:$0xff]  ;;  %v19_v1 = vld [vmem:[%s269_s0 + $0x8] sm:$0xff]  ;;  %v20_v2 = vld [vmem:[%s269_s0 + $0x10] sm:$0xff]  ;;  %188 = vset.pattern.permute.xlu0 %v197_v3 }
   0x2   :  { %v179_v4 = vpack.c.bf16 %v19_v1, %v18_v0  ;;  %v21_v5 = vld [vmem:[%s269_s0 + $0x18] sm:$0xff]  ;;  %v16_v6 = vld [vmem:[%s270_s1] sm:$0xff]  ;;  %v23_v9 = vld [vmem:[%s271_s2 + $0x8] sm:$0xff] }
   0x3   :  { %v183_v7 = vpack.c.bf16 %v21_v5, %v20_v2  ;;  %176 = vmatprep.mubr.msk.f32.mxu0 %vm34_vm0, %v16_v6  ;;  %v22_v8 = vld [vmem:[%s271_s2] sm:$0xff]  ;;  %v17_v10 = vld [vmem:[%s270_s1 + $0x8] sm:$0xff] }
   0x4   :  { %180 = vmatprep.subr.bf16.mxu0 %v179_v4  ;;  %26 = vperm.xlu0 %188, %v22_v8  }
   0x5   :  { %182 = vmatpush3.bf16.msra.mxu0 %v179_v4 }
   0x6   :  { %184 = vmatprep.subr.bf16.mxu0 %v183_v7 }
   0x8   :  { %31 = vperm.xlu0 %188, %v23_v9  }
   0x9   :  { %186 = vmatpush3.bf16.msra.mxu0 %v183_v7 }
   0xc   :  { %177 = vmatmul.mubr.msk.f32.vlgmr.msra.gmra.mrb[0].mxu0 %vm34_vm0, %v17_v10 }
  0x83   :  { %v27_v11 = vpop.permute.xlu0 %26 }
  0x87   :  { %v32_v12 = vpop.permute.xlu0 %31 }
  0xdf   :  { %v178_v13 = vpop.f32.mrb[0].mxu0 }
  0xe0   :  { %v113_v14 = vadd.f32 %v178_v13, %v32_v12  ;;  %v107_v15 = vpop.f32.mrb[1].mxu0 }
  0xe1   :  { %v108_v16 = vadd.f32 %v107_v15, %v27_v11 }
  0xe2   :  { %v118_v17 = vsel %vm116_vm1, %v113_v14, -inf }
  0xe3   :  { %v117_v18 = vsel %vm116_vm1, %v108_v16, -inf }
  0xe4   :  { %v119_v19 = vmax.f32 %v117_v18, %v118_v17 }
  0xe6   :  { %v120_v20 = vrot.slane %v119_v19, 4 }
  0xe8   :  { %v121_v21 = vmax.f32 %v119_v19, %v120_v20 }
  0xea   :  { %v122_v22 = vrot.slane %v121_v21, 2 }
  0xec   :  { %v123_v23 = vmax.f32 %v121_v21, %v122_v22 }
  0xee   :  { %v124_v24 = vrot.slane %v123_v23, 1 }
  0xf0   :  { %v125_v25 = vmax.f32 %v123_v23, %v124_v24 }
  0xf2   :  { %v126_v26 = vsub.f32 %v108_v16, %v125_v25  ;;  %v127_v27 = vsub.f32 %v113_v14, %v125_v25 }
  0xf4   :  { %v128_v28 = vmul.f32 1.442695, %v126_v26  ;;  %v130_v29 = vmul.f32 1.442695, %v127_v27 }
  0xf6   :  { %189 = vpow2.f32 %v128_v28 }
  0xf7   :  { %191 = vpow2.f32 %v130_v29 }
 0x100   :  { %v190_v30 = vpop.eup %189 }
 0x101   :  { %v192_v31 = vpop.eup %191  ;;  %v132_v32 = vsel %vm116_vm1, %v190_v30, 0.0 }
 0x102   :  { %v133_v33 = vsel %vm116_vm1, %v192_v31, 0.0 }
 0x103   :  { %v134_v34 = vadd.f32 %v133_v33, %v132_v32 }
 0x105   :  { %v135_v35 = vrot.slane %v134_v34, 4 }
 0x107   :  { %v136_v36 = vadd.f32 %v135_v35, %v134_v34 }
 0x109   :  { %v137_v37 = vrot.slane %v136_v36, 2 }
 0x10b   :  { %v138_v38 = vadd.f32 %v137_v37, %v136_v36 }
 0x10d   :  { %v139_v39 = vrot.slane %v138_v38, 1 }
 0x10f   :  { %v140_v40 = vadd.f32 %v139_v39, %v138_v38 }
 0x111   :  { %193 = vlog2.f32 %v140_v40 }
 0x112   :  { %195 = vrcp.f32 %v140_v40 }
 0x11b   :  { %v194_v41 = vpop.eup %193 }
 0x11c   :  { %v196_v42 = vpop.eup %195  ;;  %v142_v43 = vmul.f32 0.6931472, %v194_v41 }
 0x11d   :  { %v148_v44 = vmul.f32 %v196_v42, %v190_v30  ;;  %v149_v45 = vmul.f32 %v196_v42, %v192_v31 }
 0x11e   :  { %v143_v46 = vsub.f32 %v126_v26, %v142_v43  ;;  %v144_v47 = vsub.f32 %v127_v27, %v142_v43 }
 0x11f   :  { %150 = vst.msk [vmem:[%s272_s4] sm:$0xff] %vm116_vm1, %v148_v44  ;;  %151 = vst.msk [vmem:[%s272_s4 + $0x8] sm:$0xff] %vm116_vm1, %v149_v45 }
 0x120   :  { %145 = vst.msk [vmem:[%s273_s3] sm:$0xff] %vm116_vm1, %v143_v46  ;;  %146 = vst.msk [vmem:[%s273_s3 + $0x8] sm:$0xff] %vm116_vm1, %v144_v47 }

</bundles_post_ra>
